<compile_context>
chip_gen: v7x
topology: tpu7x:2x2x1
jax: 0.10.0
libtpu: 0.0.40
codegen_flags: <defaults>
</compile_context>

<pallas_src>
import functools

import jax
import jax.numpy as jnp
from jax.experimental import pallas as pl
from jax.experimental.pallas import tpu as pltpu

HIDDEN = 256
LANES = 128
ROW_ALIGN = 16                        # bf16 sublane packing: batch tiles multiples of 16
NEG_INF = -1e30                       # padded-class bias -> exp() underflows to exactly 0
VMEM_TILE_BUDGET = 24 * 1024 * 1024   # tiles (double-buffered) + resident weights fit here
VMEM_LIMIT_BYTES = 32 * 1024 * 1024   # explicit scoped-VMEM limit (safe on v5e/v6e/v7x)
MAX_TB = 4096


def _cdiv(a, b):
    return (a + b - 1) // b


def _round_up(x, m):
    return ((x + m - 1) // m) * m


def car_model_kernel(x_ref, w1_ref, b1_ref, w2_ref, b2_ref, o_ref):
    # linear1: (TB, no_input)bf16 @ (no_input, 256)bf16 -> f32, + bias, tanh in f32
    h = jnp.tanh(
        jnp.dot(x_ref[...], w1_ref[...], preferred_element_type=jnp.float32) + b1_ref[...]
    )
    # dropout1(p=0.2): identity in eval mode
    # TODO(synk): training-mode dropout (pltpu.prng_random_bits mask + 1/0.8 scaling).
    # linear2 (lane-padded): (TB, 256)bf16 @ (256, 128)bf16 -> f32, + padded bias
    logits = (
        jnp.dot(h.astype(jnp.bfloat16), w2_ref[...], preferred_element_type=jnp.float32)
        + b2_ref[...]
    )
    # softmax over the padded lane dim; padded lanes carry -1e30 bias -> exp() == 0
    m = jnp.max(logits, axis=-1, keepdims=True)
    e = jnp.exp(logits - m)
    denom_inv = pl.reciprocal(jnp.sum(e, axis=-1, keepdims=True), approx=True)
    o_ref[...] = (e * denom_inv).astype(o_ref.dtype)


def prepare_car_model_params(w1, b1, w2, b2):
    """One-time param prep: lane-pad linear2 to 128 classes, cast weights to bf16."""
    no_input, hidden = w1.shape
    hidden2, no_output = w2.shape
    assert hidden == HIDDEN and hidden2 == HIDDEN
    n_pad = max(LANES, _round_up(no_output, LANES))
    w2p = jnp.pad(w2, ((0, 0), (0, n_pad - no_output)))
    b2p = jnp.pad(b2, ((0, 0), (0, n_pad - no_output)), constant_values=NEG_INF)
    return (
        w1.astype(jnp.bfloat16),
        b1.astype(jnp.float32),
        w2p.astype(jnp.bfloat16),
        b2p.astype(jnp.float32),
    )


def _pick_batch_tile(batch, no_input, n_pad):
    """Largest VMEM-fitting batch tile, minimal padding, >=2 grid steps when batch allows."""
    weight_bytes = no_input * HIDDEN * 2 + HIDDEN * 4 + HIDDEN * n_pad * 2 + n_pad * 4
    per_row_bytes = (
        2 * no_input * 2          # x tile, bf16, double-buffered
        + 2 * n_pad * 2           # out tile, bf16, double-buffered
        + (HIDDEN + n_pad) * 4    # h / logits f32 temporaries
    )
    tb_cap = (VMEM_TILE_BUDGET - weight_bytes) // per_row_bytes
    tb_cap = max(ROW_ALIGN, min(MAX_TB, (tb_cap // ROW_ALIGN) * ROW_ALIGN))
    # TODO(synk): if no_input is so large that resident w1 alone blows the budget, a
    # K-tiled ("arbitrary") grid axis with an f32 accumulator scratch would be needed.

    num_tiles = _cdiv(batch, tb_cap)
    if num_tiles == 1 and batch >= 2 * ROW_ALIGN:
        num_tiles = 2             # shard the parallel batch axis across both v7x TensorCores
    tb = _round_up(_cdiv(batch, num_tiles), ROW_ALIGN)
    return tb, num_tiles


@functools.partial(jax.jit, static_argnames=("no_output",))
def car_model_forward(x, w1, b1, w2p, b2p, *, no_output):
    batch, no_input = x.shape
    n_pad = w2p.shape[-1]
    assert w1.shape == (no_input, HIDDEN) and w2p.shape == (HIDDEN, n_pad)

    tb, num_tiles = _pick_batch_tile(batch, no_input, n_pad)
    b_pad = tb * num_tiles
    xp = jnp.pad(x.astype(jnp.bfloat16), ((0, b_pad - batch), (0, 0)))

    flops = 2 * b_pad * (no_input * HIDDEN + HIDDEN * n_pad)
    transcendentals = b_pad * (HIDDEN + n_pad)              # tanh + exp
    bytes_accessed = (
        2 * b_pad * no_input                                # x (bf16)
        + no_input * HIDDEN * 2 + HIDDEN * 4                # w1 (bf16), b1 (f32)
        + HIDDEN * n_pad * 2 + n_pad * 4                    # w2p (bf16), b2p (f32)
        + 2 * b_pad * n_pad                                 # out (bf16)
    )

    out_padded = pl.pallas_call(
        car_model_kernel,
        out_shape=jax.ShapeDtypeStruct((b_pad, n_pad), jnp.bfloat16),
        grid=(num_tiles,),
        in_specs=[
            pl.BlockSpec((tb, no_input), lambda i: (i, 0)),        # x: tiled over batch
            pl.BlockSpec((no_input, HIDDEN), lambda i: (0, 0)),    # w1: VMEM-resident
            pl.BlockSpec((1, HIDDEN), lambda i: (0, 0)),           # b1: VMEM-resident
            pl.BlockSpec((HIDDEN, n_pad), lambda i: (0, 0)),       # w2 (padded): resident
            pl.BlockSpec((1, n_pad), lambda i: (0, 0)),            # b2 (padded): resident
        ],
        out_specs=pl.BlockSpec((tb, n_pad), lambda i: (i, 0)),
        compiler_params=pltpu.CompilerParams(
            dimension_semantics=("parallel",),
            vmem_limit_bytes=VMEM_LIMIT_BYTES,
        ),
        cost_estimate=pl.CostEstimate(
            flops=flops,
            transcendentals=transcendentals,
            bytes_accessed=bytes_accessed,
        ),
    )(xp, w1, b1, w2p, b2p)

    # Strip batch padding and pad lanes.  Kept inside this jit so XLA fuses the slice with
    # downstream consumers rather than performing a second full HBM pass over the slab.
    return out_padded[:batch, :no_output]


def init_params(key, no_input, no_output, hidden=HIDDEN):
    # Deterministic init mirroring torch.nn.Linear default: U(-1/sqrt(fan_in), 1/sqrt(fan_in))
    k1, k2, k3, k4 = jax.random.split(key, 4)
    bound1 = 1.0 / jnp.sqrt(no_input)
    bound2 = 1.0 / jnp.sqrt(hidden)
    w1 = jax.random.uniform(k1, (no_input, hidden), jnp.float32, -bound1, bound1)
    b1 = jax.random.uniform(k2, (1, hidden), jnp.float32, -bound1, bound1)
    w2 = jax.random.uniform(k3, (hidden, no_output), jnp.float32, -bound2, bound2)
    b2 = jax.random.uniform(k4, (1, no_output), jnp.float32, -bound2, bound2)
    return w1, b1, w2, b2


if __name__ == "__main__":
    key = jax.random.PRNGKey(0)
    kx, kp = jax.random.split(key)

    batch, no_input, no_output = 8, 32, 16
    x = jax.random.normal(kx, (batch, no_input), jnp.float32)
    w1, b1, w2, b2 = init_params(kp, no_input, no_output)
    w1b, b1f, w2pb, b2pf = prepare_car_model_params(w1, b1, w2, b2)

    out = car_model_forward(x, w1b, b1f, w2pb, b2pf, no_output=no_output)
    jax.block_until_ready(out)

    assert out.shape == (batch, no_output)
    out_f32 = out.astype(jnp.float32)

    # bf16 output + bf16 MXU inputs + approx reciprocal -> modest tolerances
    assert jnp.allclose(jnp.sum(out_f32, axis=-1), 1.0, atol=1e-2)

    # Reference check in plain JAX (eval-mode dropout == identity)
    ref = jax.nn.softmax(jnp.tanh(x @ w1 + b1) @ w2 + b2, axis=-1)
    assert jnp.allclose(out_f32, ref, atol=1e-2, rtol=1e-2)

    print("KERNEL_OK")
</pallas_src>

<mosaic_0001>
module attributes {stable_mosaic.version = 11 : i64} {
  func.func @car_model_kernel(%arg0: i32, %arg1: memref<16x32xbf16, #tpu.memory_space<vmem>>, %arg2: memref<32x256xbf16, #tpu.memory_space<vmem>>, %arg3: memref<1x256xf32, #tpu.memory_space<vmem>>, %arg4: memref<256x128xbf16, #tpu.memory_space<vmem>>, %arg5: memref<1x128xf32, #tpu.memory_space<vmem>>, %arg6: memref<16x128xbf16, #tpu.memory_space<vmem>>) attributes {dimension_semantics = [#tpu.dimension_semantics<parallel>], iteration_bounds = array<i64: 1>, scalar_prefetch = 0 : i64, scratch_operands = 0 : i64, tpu.core_type = #tpu.core_type<tc>, window_params = [{transform_indices = @transform_0, window_bounds = array<i64: 16, 32>}, {pipeline_mode = #tpu.pipeline_mode<synchronous>, transform_indices = @transform_1, window_bounds = array<i64: 32, 256>}, {pipeline_mode = #tpu.pipeline_mode<synchronous>, transform_indices = @transform_2, window_bounds = array<i64: 1, 256>}, {pipeline_mode = #tpu.pipeline_mode<synchronous>, transform_indices = @transform_3, window_bounds = array<i64: 256, 128>}, {pipeline_mode = #tpu.pipeline_mode<synchronous>, transform_indices = @transform_4, window_bounds = array<i64: 1, 128>}, {transform_indices = @transform_5, window_bounds = array<i64: 16, 128>}]} {
    %c0 = arith.constant 0 : index
    %c0_0 = arith.constant 0 : index
    %0 = vector.load %arg1[%c0, %c0_0] : memref<16x32xbf16, #tpu.memory_space<vmem>>, vector<16x32xbf16>
    %c0_1 = arith.constant 0 : index
    %c0_2 = arith.constant 0 : index
    %1 = vector.load %arg2[%c0_1, %c0_2] : memref<32x256xbf16, #tpu.memory_space<vmem>>, vector<32x256xbf16>
    %cst = arith.constant dense<0.000000e+00> : vector<16x256xf32>
    %2 = tpu.matmul %0, %1, %cst {dimension_numbers = #tpu.dot_dimension_numbers<[1], [0], [0], [1], [0, 0, 1, 1], [], []>} : vector<16x32xbf16>, vector<32x256xbf16>, vector<16x256xf32> -> vector<16x256xf32>
    %c0_3 = arith.constant 0 : index
    %c0_4 = arith.constant 0 : index
    %3 = vector.load %arg3[%c0_3, %c0_4] : memref<1x256xf32, #tpu.memory_space<vmem>>, vector<1x256xf32>
    %4 = vector.broadcast %3 : vector<1x256xf32> to vector<16x256xf32>
    %5 = arith.addf %2, %4 : vector<16x256xf32>
    %6 = math.tanh %5 : vector<16x256xf32>
    %7 = arith.truncf %6 : vector<16x256xf32> to vector<16x256xbf16>
    %c0_5 = arith.constant 0 : index
    %c0_6 = arith.constant 0 : index
    %8 = vector.load %arg4[%c0_5, %c0_6] : memref<256x128xbf16, #tpu.memory_space<vmem>>, vector<256x128xbf16>
    %cst_7 = arith.constant dense<0.000000e+00> : vector<16x128xf32>
    %9 = tpu.matmul %7, %8, %cst_7 {dimension_numbers = #tpu.dot_dimension_numbers<[1], [0], [0], [1], [0, 0, 1, 1], [], []>} : vector<16x256xbf16>, vector<256x128xbf16>, vector<16x128xf32> -> vector<16x128xf32>
    %c0_8 = arith.constant 0 : index
    %c0_9 = arith.constant 0 : index
    %10 = vector.load %arg5[%c0_8, %c0_9] : memref<1x128xf32, #tpu.memory_space<vmem>>, vector<1x128xf32>
    %11 = vector.broadcast %10 : vector<1x128xf32> to vector<16x128xf32>
    %12 = arith.addf %9, %11 : vector<16x128xf32>
    %cst_10 = arith.constant dense<0xFF800000> : vector<16xf32>
    %13 = vector.multi_reduction <maximumf>, %12, %cst_10 [1] : vector<16x128xf32> to vector<16xf32>
    %14 = vector.shape_cast %13 : vector<16xf32> to vector<16x1xf32>
    %15 = vector.broadcast %14 : vector<16x1xf32> to vector<16x128xf32>
    %16 = arith.subf %12, %15 : vector<16x128xf32>
    %17 = math.exp %16 : vector<16x128xf32>
    %cst_11 = arith.constant dense<0.000000e+00> : vector<16xf32>
    %18 = vector.multi_reduction <add>, %17, %cst_11 [1] : vector<16x128xf32> to vector<16xf32>
    %19 = vector.shape_cast %18 : vector<16xf32> to vector<16x1xf32>
    %20 = tpu.reciprocal %19 {approx = true} : vector<16x1xf32> -> vector<16x1xf32>
    %21 = vector.broadcast %20 : vector<16x1xf32> to vector<16x128xf32>
    %22 = arith.mulf %17, %21 : vector<16x128xf32>
    %23 = arith.truncf %22 : vector<16x128xf32> to vector<16x128xbf16>
    %c0_12 = arith.constant 0 : index
    %c0_13 = arith.constant 0 : index
    %24 = vector.load %arg6[%c0_12, %c0_13] : memref<16x128xbf16, #tpu.memory_space<vmem>>, vector<16x128xbf16>
    tpu.vector_store %arg6[%c0_12, %c0_13], %23 {strides = array<i32>} : memref<16x128xbf16, #tpu.memory_space<vmem>>, vector<16x128xbf16>,
    return
  }
  func.func @transform_0(%arg0: i32) -> (i32, i32) {
    %c0_i32 = arith.constant 0 : i32
    %c0_i32_0 = arith.constant 0 : i32
    return %arg0, %c0_i32 : i32, i32
  }
  func.func @transform_1(%arg0: i32) -> (i32, i32) {
    %c0_i32 = arith.constant 0 : i32
    %c0_i32_0 = arith.constant 0 : i32
    %c0_i32_1 = arith.constant 0 : i32
    return %c0_i32, %c0_i32_0 : i32, i32
  }
  func.func @transform_2(%arg0: i32) -> (i32, i32) {
    %c0_i32 = arith.constant 0 : i32
    %c0_i32_0 = arith.constant 0 : i32
    %c0_i32_1 = arith.constant 0 : i32
    return %c0_i32, %c0_i32_0 : i32, i32
  }
  func.func @transform_3(%arg0: i32) -> (i32, i32) {
    %c0_i32 = arith.constant 0 : i32
    %c0_i32_0 = arith.constant 0 : i32
    %c0_i32_1 = arith.constant 0 : i32
    return %c0_i32, %c0_i32_0 : i32, i32
  }
  func.func @transform_4(%arg0: i32) -> (i32, i32) {
    %c0_i32 = arith.constant 0 : i32
    %c0_i32_0 = arith.constant 0 : i32
    %c0_i32_1 = arith.constant 0 : i32
    return %c0_i32, %c0_i32_0 : i32, i32
  }
  func.func @transform_5(%arg0: i32) -> (i32, i32) {
    %c0_i32 = arith.constant 0 : i32
    %c0_i32_0 = arith.constant 0 : i32
    return %arg0, %c0_i32 : i32, i32
  }
}

</mosaic_0001>

<bundles_post_ra>
// kernel: car_model_forward.1
= control target key start
LH: loop header
LB: loop body
LE: loop exit
PB: predicated region body
PF: predicated region fallthrough
CT: control target
= control target key end

     0   :  { %10 = vsyncpa [#allocation3], 0  ;;  %s576_s0 = inlined_call_operand.vmem [shape: bf16[16,32], index: 0, kind: input, shape index: {}]   ;;  %s577_s1 = inlined_call_operand.hbm [shape: bf16[32,256], index: 1, kind: input, shape index: {}]   ;;  %s578_s2 = inlined_call_operand.vmem [shape: f32[1,256], index: 2, kind: input, shape index: {}]   ;;  %s579_s3 = inlined_call_operand.hbm [shape: bf16[256,128], index: 3, kind: input, shape index: {}]   ;;  %s580_s4 = inlined_call_operand.vmem [shape: f32[1,128], index: 4, kind: input, shape index: {}]   ;;  %s581_s5 = inlined_call_operand.vmem [shape: bf16[16,128], index: 5, kind: output, shape index: {}]  }
   0x1   :  { %11 = vsyncpa [#allocation5], 0  ;;  %s503_s18 = smov [#allocation2]   ;;  %s455_s22 = scalar_lea.hbm %s577_s1, 512 }
   0x2   :  { %s19_s19 = sshll.u32 %s503_s18, 4  ;;  %p456_p0 = scmp.ne.s32.totalorder %s577_s1, %s455_s22  ;;  %s20_s19 = int_to_ptr.vmem [resolvable:$true] %s19_s19 }
   0x3   :  { %p459_p1 = scmp.lt.u32.totalorder %s455_s22, %s577_s1 }
   0x5   :  { %p461_p2 = pnand %p459_p1, %p456_p0 }
   0x7   :  { %464 = shalt.err (!%p461_p2)
}
   0x8   :  { %s465_s27 = scalar_lea.vmem %s20_s19, 512  ;;  %p470_p4 = scmp.lt.s32.totalorder %s20_s19, %s20_s19 }
   0x9   :  { %p466_p3 = scmp.ne.s32.totalorder %s20_s19, %s465_s27  ;;  %p471_p5 = scmp.lt.s32.totalorder %s465_s27, %s465_s27 }
   0xb   :  { %p472_p6 = por %p471_p5, %p470_p4 }
   0xd   :  { %p473_p7 = pnand %p472_p6, %p466_p3 }
   0xf   :  { %476 = shalt.err (!%p473_p7)
}
  0x10   :  { %s504_s28 = smov 128   ;;  %s505_s29 = smov 8  }
  0x11   :  { %25 = dma.hbm_to_vmem [thread:$0]  %s577_s1, 512, %s20_s19, [#allocation3], %s504_s28, %s504_s28, %s505_s29  }
  0x12   :  { %s506_s7 = smov [#allocation4]   ;;  %s477_s11 = scalar_lea.hbm %s579_s3, 2048 }
  0x13   :  { %s33_s8 = sshll.u32 %s506_s7, 4  ;;  %p478_p8 = scmp.ne.s32.totalorder %s579_s3, %s477_s11  ;;  %s34_s8 = int_to_ptr.vmem [resolvable:$true] %s33_s8 }
  0x14   :  { %p481_p9 = scmp.lt.u32.totalorder %s477_s11, %s579_s3 }
  0x16   :  { %p483_p10 = pnand %p481_p9, %p478_p8 }
  0x18   :  { %486 = shalt.err (!%p483_p10)
}
  0x19   :  { %s487_s16 = scalar_lea.vmem %s34_s8, 2048  ;;  %p492_p12 = scmp.lt.s32.totalorder %s34_s8, %s34_s8 }
  0x1a   :  { %p488_p11 = scmp.ne.s32.totalorder %s34_s8, %s487_s16  ;;  %p493_p13 = scmp.lt.s32.totalorder %s487_s16, %s487_s16 }
  0x1c   :  { %p494_p0 = por %p493_p13, %p492_p12 }
  0x1e   :  { %p495_p1 = pnand %p494_p0, %p488_p11 }
  0x20   :  { %498 = shalt.err (!%p495_p1)
}
  0x21   :  { %s507_s1 = smov 64   ;;  %s508_s17 = smov 4  }
  0x22   :  { %39 = dma.hbm_to_vmem [thread:$0]  %s579_s3, 2048, %s34_s8, [#allocation5], %s507_s1, %s507_s1, %s508_s17  }
  0x23   :  { %499 = dma.done.wait [#allocation3], 512  }
  0x24   :  { %500 = vsyncadd [#allocation3], 4294966784 }
  0x25   :  { %501 = dma.done.wait [#allocation5], 2048  }
  0x26   :  { %502 = vsyncadd [#allocation5], 4294965248  ;;  %v509_v0 = vmov 0   ;;  %v416_v1 = vld [vmem:[#allocation2 + $0x4] ss:$8 sps:$4 sm:$0xff]   ;;  %vm92_vm0 = vcmask 261120   ;;  %v57_v22 = vlaneseq }
  0x27   :  { %128 = vmatprep.mubr.bf16.mxu0 %v509_v0  ;;  %v418_v2 = vld [vmem:[#allocation2] ss:$8 sps:$4 sm:$0xff]   ;;  %96 = vmatprep.subr.bf16.mxu0 %v416_v1  ;;  %v419_v3 = vld [vmem:[#allocation2 + $0x14] ss:$8 sps:$4 sm:$0xff]   ;;  %v421_v4 = vld [vmem:[#allocation2 + $0x10] ss:$8 sps:$4 sm:$0xff]  }
  0x28   :  { %97 = vmatpush1.bf16.msra.mxu0 %v418_v2  ;;  %v422_v5 = vld [vmem:[%s576_s0] sm:$0xff]   ;;  %v425_v8 = vld [vmem:[#allocation4 + $0x48] sm:$0xff]   ;;  %v427_v10 = vld [vmem:[#allocation4 + $0x50] sm:$0xff]   ;;  %v58_v23 = vshrl.u32 %v57_v22, 7 }
  0x29   :  { %98 = vmatprep.subr.bf16.mxu0 %v419_v3  ;;  %v423_v6 = vld [vmem:[#allocation4 + $0x40] sm:$0xff]   ;;  %v426_v9 = vld [vmem:[#allocation4 + $0x8] sm:$0xff]   ;;  %v428_v11 = vld [vmem:[#allocation4 + $0x10] sm:$0xff]  }
  0x2a   :  { %v424_v7 = vld [vmem:[#allocation4] sm:$0xff]   ;;  %387 = vmatprep.subr.bf16.mxu1 %v423_v6  ;;  %v429_v12 = vld [vmem:[#allocation4 + $0x58] sm:$0xff]   ;;  %v433_v16 = vld [vmem:[#allocation4 + $0x68] sm:$0xff]   ;;  %v59_v24 = vsub.s32 0, %v58_v23  ;;  %v63_v26 = vsub.s32 1, %v58_v23 }
  0x2b   :  { %388 = vmatpush3.bf16.msra.mxu1 %v424_v7  ;;  %v430_v13 = vld [vmem:[#allocation4 + $0x18] sm:$0xff]   ;;  %v431_v14 = vld [vmem:[#allocation4 + $0x60] sm:$0xff]   ;;  %v434_v17 = vld [vmem:[#allocation4 + $0x28] sm:$0xff]  }
  0x2c   :  { %99 = vmatpush1.bf16.msra.mxu0 %v421_v4  ;;  %389 = vmatprep.subr.bf16.mxu1 %v425_v8  ;;  %v432_v15 = vld [vmem:[#allocation4 + $0x20] sm:$0xff]   ;;  %v435_v18 = vld [vmem:[#allocation4 + $0x70] sm:$0xff]   ;;  %v437_v20 = vld [vmem:[#allocation4 + $0x78] sm:$0xff]  }
  0x2d   :  { %v436_v19 = vld [vmem:[#allocation4 + $0x30] sm:$0xff]   ;;  %v438_v21 = vld [vmem:[#allocation4 + $0x38] sm:$0xff]   ;;  %v55_v25 = vld [vmem:[%s578_s2] sm:$0x3] }
  0x2e   :  { %v60_v27 = vrot.slane %v55_v25, %v59_v24  ;;  %v64_v28 = vrot.slane %v55_v25, %v63_v26  ;;  %v361_v45 = vld [vmem:[%s580_s4] ss:$0 sm:$0xff] }
  0x2f   :  { %360 = vmatmul.mubr.msk.bf16.vlgmr.msra.gmra.mrb[0].mxu0 %vm92_vm0, %v422_v5  ;;  %390 = vmatpush3.bf16.msra.mxu1 %v426_v9 }
  0x30   :  { %391 = vmatprep.subr.bf16.mxu1 %v427_v10 }
  0x33   :  { %392 = vmatpush3.bf16.msra.mxu1 %v428_v11 }
  0x34   :  { %393 = vmatprep.subr.bf16.mxu1 %v429_v12 }
  0x37   :  { %394 = vmatpush3.bf16.msra.mxu1 %v430_v13 }
  0x38   :  { %395 = vmatprep.subr.bf16.mxu1 %v431_v14 }
  0x3b   :  { %396 = vmatpush3.bf16.msra.mxu1 %v432_v15 }
  0x3c   :  { %397 = vmatprep.subr.bf16.mxu1 %v433_v16 }
  0x3f   :  { %398 = vmatpush3.bf16.msra.mxu1 %v434_v17 }
  0x40   :  { %399 = vmatprep.subr.bf16.mxu1 %v435_v18 }
  0x43   :  { %400 = vmatpush3.bf16.msra.mxu1 %v436_v19 }
  0x44   :  { %401 = vmatprep.subr.bf16.mxu1 %v437_v20 }
  0x47   :  { %402 = vmatpush3.bf16.msra.mxu1 %v438_v21 }
 0x102   :  { %v130_v29 = vpop.f32.mrb[0].mxu0 }
 0x103   :  { %v131_v30 = vadd.f32 %v130_v29, %v60_v27  ;;  %v132_v31 = vpop.f32.mrb[1].mxu0 }
 0x104   :  { %v133_v32 = vadd.f32 %v132_v31, %v64_v28  ;;  %v134_v33 = vpop.f32.mrb[2].mxu0 }
 0x105   :  { %439 = vtanh.f32 %v131_v30  ;;  %v135_v34 = vadd.f32 %v134_v33, %v60_v27  ;;  %v136_v35 = vpop.f32.mrb[3].mxu0 }
 0x106   :  { %441 = vtanh.f32 %v133_v32  ;;  %v137_v36 = vadd.f32 %v136_v35, %v64_v28 }
 0x107   :  { %443 = vtanh.f32 %v135_v34 }
 0x108   :  { %445 = vtanh.f32 %v137_v36 }
 0x10f   :  { %v440_v37 = vpop.eup %439 }
 0x110   :  { %v442_v38 = vpop.eup %441 }
 0x111   :  { %v444_v39 = vpop.eup %443 }
 0x112   :  { %v446_v40 = vpop.eup %445  ;;  %v143_v41 = vpack.c.bf16 %v444_v39, %v440_v37 }
 0x113   :  { %v144_v42 = vpack.c.bf16 %v446_v40, %v442_v38 }
 0x115   :  { %312 = vmatprep.mubr.bf16.mxu1 %v144_v42 }
 0x116   :  { %313 = vmatmul.mubr.bf16.vlgmr.msra.gmra.mrb[0].mxu1 %v143_v41 }
 0x1e9   :  { %v403_v43 = vpop.f32.mrb[0].mxu1 }
 0x1ea   :  { %v404_v44 = vpop.f32.mrb[1].mxu1 }
 0x1eb   :  { %v405_v46 = vadd.f32 %v404_v44, %v403_v43  ;;  %v406_v47 = vpop.f32.mrb[2].mxu1 }
 0x1ec   :  { %v407_v48 = vpop.f32.mrb[3].mxu1 }
 0x1ed   :  { %v408_v49 = vadd.f32 %v407_v48, %v406_v47  ;;  %v315_v50 = vadd.f32 %v405_v46, %v361_v45 }
 0x1ef   :  { %321 = vmax.xlane.f32.xlu0 %v315_v50  ;;  %v318_v51 = vadd.f32 %v408_v49, %v361_v45 }
 0x1f3   :  { %323 = vmax.xlane.f32.xlu0 %v318_v51 }
 0x27c   :  { %v322_v52 = vpop.xlane.xlu0 %321 }
 0x27d   :  { %v325_v53 = vsub.f32 %v315_v50, %v322_v52 }
 0x27f   :  { %v327_v54 = vmul.f32 1.442695, %v325_v53 }
 0x280   :  { %v324_v55 = vpop.xlane.xlu0 %323 }
 0x281   :  { %447 = vpow2.f32 %v327_v54  ;;  %v326_v56 = vsub.f32 %v318_v51, %v324_v55 }
 0x283   :  { %v329_v57 = vmul.f32 1.442695, %v326_v56 }
 0x285   :  { %449 = vpow2.f32 %v329_v57 }
 0x28b   :  { %v448_v58 = vpop.eup %447 }
 0x28c   :  { %331 = vadd.xlane.f32.xlu1 %v448_v58 }
 0x28f   :  { %v450_v59 = vpop.eup %449 }
 0x290   :  { %333 = vadd.xlane.f32.xlu1 %v450_v59 }
 0x319   :  { %v332_v60 = vpop.xlane.xlu1 %331 }
 0x31a   :  { %451 = vrcp.f32 %v332_v60 }
 0x31d   :  { %v334_v61 = vpop.xlane.xlu1 %333 }
 0x31e   :  { %453 = vrcp.f32 %v334_v61 }
 0x324   :  { %v452_v62 = vpop.eup %451 }
 0x325   :  { %v337_v0 = vmul.f32 %v452_v62, %v448_v58 }
 0x328   :  { %v454_v63 = vpop.eup %453 }
 0x329   :  { %v338_v1 = vmul.f32 %v454_v63, %v450_v59 }
 0x32b   :  { %v385_v2 = vpack.c.bf16 %v338_v1, %v337_v0 }
 0x32d   :  { %386 = vst [vmem:[%s581_s5] sm:$0xff] %v385_v2  }
 0x32e   :  { %353 = vsyncpa [#allocation3], 1 }
 0x32f   :  { %354 = vsyncpa [#allocation5], 1 }

</bundles_post_ra>
